<compile_context>
chip_gen: v6e
topology: v6e:2x2x1
jax: 0.10.0
libtpu: 0.0.40
codegen_flags: <defaults>
</compile_context>

<pallas_src>
import jax
import jax.numpy as jnp
from jax import lax
from jax.experimental import pallas as pl
from jax.experimental.pallas import tpu as pltpu


_TARGET_TILE_BYTES = 2 << 20   # ~2 MiB output tile: ~85%+ of HBM store roofline,
                               # 2x double-buffered = 4 MiB, safe on all generations.
_LANE_TILE_CAP = 2048          # lanes per tile (multiple of 128): the (8, lane_tile)
                               # broadcast chunk stays <= 64 KiB = 16 vregs.


def _choose_tiles(B: int, CKL: int, itemsize: int):
    """Pick (batch_tile, lane_tile) for the (B, C*K*L) output."""
    # Lane tile: full extent when small (always legal), else a multiple of 128.
    ckl_t = CKL if CKL <= _LANE_TILE_CAP else _LANE_TILE_CAP
    row_bytes = ckl_t * itemsize
    bt = max(1, _TARGET_TILE_BYTES // row_bytes)
    if bt >= B:
        bt = B                        # full extent (always legal, single batch tile)
    else:
        bt = max(8, (bt // 8) * 8)    # multiple of 8 keeps sublanes dense
    return bt, ckl_t


def _spatial_embedding_kernel(s_ref, o_ref):
    # s_ref: (1, ckl_t) lane-dense slice of the pre-transposed/expanded table.
    # o_ref: (bt, ckl_t) output tile -> pure batch broadcast + store.
    bt, ckl_t = o_ref.shape
    row = s_ref[...]                                   # (1, ckl_t)
    if bt > 8 and bt % 8 == 0:
        # Build one dense 8-sublane chunk (<= 16 vregs) and reuse it for every
        # 8-row store; keeps the kernel store/DMA-bound, not spill-bound.
        chunk = jnp.broadcast_to(row, (8, ckl_t))

        def body(i, carry):
            r0 = pl.multiple_of(i * 8, 8)
            o_ref[pl.ds(r0, 8), :] = chunk
            return carry

        lax.fori_loop(0, bt // 8, body, 0)
    else:
        # Small batch tile (bt == B, possibly not a multiple of 8): direct store.
        o_ref[...] = jnp.broadcast_to(row, (bt, ckl_t))


def spatial_embedding(weight: jax.Array, B: int, L: int) -> jax.Array:
    """weight: (K, C). Returns (B, C, K, L), identical to the PyTorch forward."""
    K, C = weight.shape
    CKL = C * K * L
    itemsize = jnp.dtype(weight.dtype).itemsize

    # Hoisted out of the kernel (runs once in XLA over C*K*L elements):
    # permute(1,0) + expand over L, flattened lane-dense so that
    #   slab[0, c*K*L + k*L + l] == weight[k, c].
    slab = jnp.reshape(
        jnp.broadcast_to(weight.T[:, :, None], (C, K, L)), (1, CKL)
    )

    bt, ckl_t = _choose_tiles(B, CKL, itemsize)
    # Lane axis outer, batch axis inner: the tiny slab tile stays resident across
    # the inner batch loop. Ragged last blocks are masked by Pallas (cdiv grid).
    grid = (pl.cdiv(CKL, ckl_t), pl.cdiv(B, bt))

    cost = pl.CostEstimate(
        flops=0,
        transcendentals=0,
        bytes_accessed=CKL * itemsize + B * CKL * itemsize,
    )

    out_flat = pl.pallas_call(
        _spatial_embedding_kernel,
        out_shape=jax.ShapeDtypeStruct((B, CKL), weight.dtype),
        grid_spec=pltpu.PrefetchScalarGridSpec(
            num_scalar_prefetch=0,
            grid=grid,
            in_specs=[pl.BlockSpec((1, ckl_t), lambda c, b: (0, c))],
            out_specs=pl.BlockSpec((bt, ckl_t), lambda c, b: (b, c)),
        ),
        compiler_params=pltpu.CompilerParams(
            # All tiles are independent -> both axes shard across v7x's 2 TCs;
            # on 1-TC v5e/v6e this is a plain sequential loop with no penalty.
            dimension_semantics=("parallel", "parallel"),
        ),
        cost_estimate=cost,
    )(slab)

    # (B, C*K*L) -> (B, C, K, L): contiguous row-major split, free metadata reshape.
    return out_flat.reshape(B, C, K, L)


def spatial_embedding_ref(weight: jax.Array, B: int, L: int) -> jax.Array:
    """Pure-JAX reference mirroring the PyTorch forward."""
    K, C = weight.shape
    embed = weight[jnp.arange(K)]                 # (K, C)
    embed = embed.T                               # (C, K)
    embed = embed[None, :, :, None]               # (1, C, K, 1)
    return jnp.broadcast_to(embed, (B, C, K, L))  # (B, C, K, L)


if __name__ == "__main__":
    # Module hyperparameters (small, consistent with the forward):
    K = 16        # number of spatial positions (embedding rows)
    channel = 4   # embedding dim / output channels
    B = 2         # batch
    L = 8         # sequence length to expand over

    # Deterministic parameter init (nn.Embedding default ~ N(0, 1)).
    key = jax.random.PRNGKey(0)
    weight = jax.random.normal(key, (K, channel), dtype=jnp.float32)

    out = spatial_embedding(weight, B, L)
    out = jax.block_until_ready(out)

    ref = spatial_embedding_ref(weight, B, L)
    assert out.shape == (B, channel, K, L), out.shape
    assert out.dtype == jnp.float32
    assert jnp.allclose(out, ref), "Pallas output mismatch vs reference"

    print("KERNEL_OK")
</pallas_src>

<mosaic_0001>
module attributes {stable_mosaic.version = 11 : i64} {
  func.func @_spatial_embedding_kernel(%arg0: i32, %arg1: i32, %arg2: memref<1x512xf32, #tpu.memory_space<vmem>>, %arg3: memref<2x512xf32, #tpu.memory_space<vmem>>) attributes {dimension_semantics = [#tpu.dimension_semantics<parallel>, #tpu.dimension_semantics<parallel>], iteration_bounds = array<i64: 1, 1>, scalar_prefetch = 0 : i64, scratch_operands = 0 : i64, tpu.core_type = #tpu.core_type<tc>, window_params = [{transform_indices = @transform_0, window_bounds = array<i64: 1, 512>}, {transform_indices = @transform_1, window_bounds = array<i64: 2, 512>}]} {
    %c0 = arith.constant 0 : index
    %c0_0 = arith.constant 0 : index
    %0 = vector.load %arg2[%c0, %c0_0] : memref<1x512xf32, #tpu.memory_space<vmem>>, vector<1x512xf32>
    %1 = vector.shape_cast %0 : vector<1x512xf32> to vector<1x512xf32>
    %2 = vector.broadcast %1 : vector<1x512xf32> to vector<2x512xf32>
    %c0_1 = arith.constant 0 : index
    %c0_2 = arith.constant 0 : index
    %3 = vector.load %arg3[%c0_1, %c0_2] : memref<2x512xf32, #tpu.memory_space<vmem>>, vector<2x512xf32>
    tpu.vector_store %arg3[%c0_1, %c0_2], %2 {strides = array<i32>} : memref<2x512xf32, #tpu.memory_space<vmem>>, vector<2x512xf32>,
    return
  }
  func.func @transform_0(%arg0: i32, %arg1: i32) -> (i32, i32) {
    %c0_i32 = arith.constant 0 : i32
    %c0_i32_0 = arith.constant 0 : i32
    return %c0_i32, %arg0 : i32, i32
  }
  func.func @transform_1(%arg0: i32, %arg1: i32) -> (i32, i32) {
    %c0_i32 = arith.constant 0 : i32
    return %arg1, %arg0 : i32, i32
  }
}

</mosaic_0001>

<bundles_post_ra>
// kernel: tpu_custom_call.1
= control target key start
LH: loop header
LB: loop body
LE: loop exit
PB: predicated region body
PF: predicated region fallthrough
CT: control target
= control target key end

     0   :  { %6 = vsyncpa [#allocation3], 0  ;;  %s139_s0 = inlined_call_operand.hbm [shape: f32[1,512], index: 0, kind: input, shape index: {}]   ;;  %s140_s1 = inlined_call_operand.hbm [shape: f32[2,512], index: 1, kind: output, shape index: {}]  }
   0x1   :  { %7 = vsyncpa [#allocation4], 0  ;;  %s120_s6 = smov [#allocation2]  }
   0x2   :  { %s14_s7 = sshll.u32 %s120_s6, 4  ;;  %s15_s7 = int_to_ptr.vmem [resolvable:$true] %s14_s7 }
   0x3   :  { %s84_s8 = scalar_lea.vmem %s15_s7, 64  ;;  %p89_p1 = scmp.lt.s32.totalorder %s15_s7, %s15_s7 }
   0x4   :  { %p85_p0 = scmp.ne.s32.totalorder %s15_s7, %s84_s8  ;;  %p90_p2 = scmp.lt.s32.totalorder %s84_s8, %s84_s8 }
   0x6   :  { %p91_p3 = por %p90_p2, %p89_p1 }
   0x8   :  { %p92_p4 = pnand %p91_p3, %p85_p0 }
   0xa   :  { %95 = shalt.err (!%p92_p4)
}
   0xb   :  { %17 = dma.hbm_to_vmem [thread:$0]  %s139_s0, 64, %s15_s7, [#allocation3]  }
   0xc   :  { %116 = dma.done.wait [#allocation3], 64  }
   0xd   :  { %117 = vsyncadd [#allocation3], 4294967232  ;;  %v23_v0 = vlaneseq  ;;  %v121_v1 = vmov 1983009808   ;;  %v21_v9 = vld [vmem:[#allocation2] sm:$0xf] }
   0xe   :  { %v42_v2 = vunpack.c.l.s4 %v121_v1  ;;  %s122_s0 = smov [#allocation5]  }
   0xf   :  { %v24_v3 = vshrl.u32 %v23_v0, 7  ;;  %s64_s11 = sshll.u32 %s122_s0, 4  ;;  %s65_s11 = int_to_ptr.vmem [resolvable:$true] %s64_s11 }
  0x10   :  { %v43_v4 = vunpack.c.0.s8 %v42_v2  ;;  %s96_s12 = scalar_lea.vmem %s65_s11, 128  ;;  %p101_p6 = scmp.lt.s32.totalorder %s65_s11, %s65_s11 }
  0x11   :  { %v25_v5 = vsub.s32 0, %v24_v3  ;;  %v29_v6 = vsub.s32 1, %v24_v3  ;;  %v33_v7 = vsub.s32 2, %v24_v3  ;;  %v37_v8 = vsub.s32 3, %v24_v3  ;;  %p97_p5 = scmp.ne.s32.totalorder %s65_s11, %s96_s12  ;;  %p102_p7 = scmp.lt.s32.totalorder %s96_s12, %s96_s12 }
  0x12   :  { %v46_v10 = vsub.s32 %v43_v4, %v24_v3 }
  0x13   :  { %v26_v11 = vrot.slane %v21_v9, %v25_v5  ;;  %v30_v12 = vrot.slane %v21_v9, %v29_v6  ;;  %v34_v13 = vrot.slane %v21_v9, %v33_v7  ;;  %v38_v14 = vrot.slane %v21_v9, %v37_v8  ;;  %p103_p8 = por %p102_p7, %p101_p6 }
  0x15   :  { %v39_v15 = vcombine.low %v26_v11, %v30_v12  ;;  %v40_v16 = vcombine.low %v34_v13, %v38_v14  ;;  %p104_p9 = pnand %p103_p8, %p97_p5 }
  0x17   :  { %v47_v17 = vrot.slane %v39_v15, %v46_v10  ;;  %v54_v18 = vrot.slane %v40_v16, %v46_v10 }
  0x19   :  { %v55_v19 = vcombine.low %v47_v17, %v54_v18 }
  0x1b   :  { %57 = vst [vmem:[#allocation5] sm:$0xff] %v55_v19 }
  0x1c   :  { %107 = shalt.err (!%p104_p9)
}
  0x1d   :  { %67 = dma.vmem_to_hbm [thread:$0]  %s65_s11, 128, %s140_s1, [#allocation4]  }
  0x1e   :  { %118 = dma.done.wait [#allocation4], 128  }
  0x1f   :  { %119 = vsyncadd [#allocation4], 4294967168 }
  0x20   :  { %71 = vsyncpa [#allocation3], 1 }
  0x21   :  { %72 = vsyncpa [#allocation4], 1 }

</bundles_post_ra>
